<compile_context>
chip_gen: v5e
topology: v5e:2x2
jax: 0.10.0
libtpu: 0.0.40
codegen_flags: <defaults>
</compile_context>

<pallas_src>
import jax
import jax.numpy as jnp
from jax.experimental import pallas as pl
from jax.experimental.pallas import tpu as pltpu

F = 5  # nn.Linear(in_features=5, out_features=5)


def _linear_t(wm, bcol, h):
    """out[j, :] = bcol[j] + sum_i wm[j, i] * h[i, :]   (h is (F, B), lane-dense).

    Features are sliced along sublanes (h[i:i+1, :]) and weight columns along
    lanes (wm[:, i:i+1]); both broadcasts are cheap.  2-way tree shortens the
    dependent add chain.  Fully unrolled at trace time (F == 5).  No MXU.
    """
    t0 = wm[:, 0:1] * h[0:1, :] + wm[:, 1:2] * h[1:2, :]
    t1 = wm[:, 2:3] * h[2:3, :] + wm[:, 3:4] * h[3:4, :]
    t2 = wm[:, 4:5] * h[4:5, :] + bcol
    return (t0 + t1) + t2


def simple_recurrent_kernel(x_ref, p_ref, o_ref):
    x = x_ref[...].astype(jnp.float32)      # (F, TB): features on sublanes, batch on lanes

    p0 = p_ref[0].astype(jnp.float32)       # (F, F+1) = [2*W | 2*(b + W.sum(1))]
    p1 = p_ref[1].astype(jnp.float32)       # (F, F+1) = [W   | b]
    w1, b1 = p0[:, :F], p0[:, F:]           # folds the `x + 1` and `* 2` steps
    w,  b  = p1[:, :F], p1[:, F:]

    h = _linear_t(w1, b1, x)                # == 2 * fc(x + 1)
    h = _linear_t(w, b, h)                  # == fc(2 * fc(x + 1))
    h = h * h * h                           # == h ** 3
    h = _linear_t(w, b, h)                  # == fc(h)

    o_ref[...] = h.astype(o_ref.dtype)


def _pick_block_lanes(B):
    """Lane (batch) block: multiple of 128 (or the full dim when B <= 128),
    >= 2 grid steps for non-trivial B (v7x dual-TC), capped so double-buffered
    in/out blocks plus compiler temporaries stay well inside scoped VMEM on
    every generation (v5e's 16 MiB default included)."""
    if B <= 128:
        return B                                    # block == full dim is always legal
    cap = 32768                                     # 8 * 32768 * 4 B = 1 MiB per buffer
    half = pl.cdiv(pl.cdiv(B, 2), 128) * 128        # round_up(ceil(B/2), 128)
    return int(min(cap, half))


def _pack_params(w, b):
    """One resident parameter block: row 0 absorbs the `x+1` and `*2` affine steps."""
    b = b.reshape(F)
    p0 = jnp.concatenate([2.0 * w, (2.0 * (b + jnp.sum(w, axis=1))).reshape(F, 1)], axis=1)
    p1 = jnp.concatenate([w, b.reshape(F, 1)], axis=1)
    return jnp.stack([p0, p1], axis=0)              # (2, F, F+1)


@jax.jit
def simple_recurrent_t(x_t, w, b):
    """Transposed-layout entry point: x_t is (F, B) (batch on lanes), returns (F, B).
    Use this directly when the producer/consumer can emit/accept this layout."""
    f, B = x_t.shape
    assert f == F
    params = _pack_params(w, b)

    block_b = _pick_block_lanes(B)
    grid = (pl.cdiv(B, block_b),)

    return pl.pallas_call(
        simple_recurrent_kernel,
        out_shape=jax.ShapeDtypeStruct((F, B), x_t.dtype),
        grid_spec=pltpu.PrefetchScalarGridSpec(
            num_scalar_prefetch=0,
            grid=grid,
            in_specs=[
                pl.BlockSpec((F, block_b), lambda i: (0, i)),       # x^T tiled over batch lanes
                pl.BlockSpec((2, F, F + 1), lambda i: (0, 0, 0)),   # packed params, resident
            ],
            out_specs=pl.BlockSpec((F, block_b), lambda i: (0, i)),
        ),
        compiler_params=pltpu.CompilerParams(
            dimension_semantics=("parallel",),       # batch tiles independent -> megacore / dual-TC
            vmem_limit_bytes=32 * 1024 * 1024,
        ),
        cost_estimate=pl.CostEstimate(
            flops=160 * B, transcendentals=0, bytes_accessed=40 * B),
    )(x_t, params)


@jax.jit
def simple_recurrent(x, w, b):
    """x: (B, 5); w: (5, 5) in PyTorch (out, in) layout; b: (5,). Returns (B, 5)."""
    B, f = x.shape
    assert f == F
    # Layout plumbing only: present a lane-dense (F, B) slab to the kernel.
    # TODO(synk): in a real pipeline the producer/consumer should emit/consume
    # the (F, B) layout directly (simple_recurrent_t) and skip these transposes.
    out_t = simple_recurrent_t(x.T, w, b)
    return out_t.T


def simple_recurrent_ref(x, w, b):
    h = x + 1.0
    h = h @ w.T + b
    h = h * 2.0
    h = h @ w.T + b
    h = h ** 3
    h = h @ w.T + b
    return h


if __name__ == "__main__":
    key = jax.random.PRNGKey(0)
    kx, kw, kb, kx2 = jax.random.split(key, 4)

    # Deterministic params mimicking Linear's uniform(-1/sqrt(in), 1/sqrt(in)) init.
    bound = 1.0 / jnp.sqrt(jnp.float32(F))
    w = jax.random.uniform(kw, (F, F), dtype=jnp.float32, minval=-bound, maxval=bound)
    b = jax.random.uniform(kb, (F,), dtype=jnp.float32, minval=-bound, maxval=bound)

    # Small shape implied by the module: batch of rows with 5 features.
    B = 8
    x = jax.random.normal(kx, (B, F), dtype=jnp.float32)
    out = jax.block_until_ready(simple_recurrent(x, w, b))
    ref = simple_recurrent_ref(x, w, b)
    assert out.shape == (B, F)
    assert jnp.allclose(out, ref, rtol=1e-4, atol=1e-4), "mismatch vs reference (small B)"

    # Also exercise the multi-tile parallel path (grid >= 2).
    B2 = 512
    x2 = jax.random.normal(kx2, (B2, F), dtype=jnp.float32)
    out2 = jax.block_until_ready(simple_recurrent(x2, w, b))
    ref2 = simple_recurrent_ref(x2, w, b)
    assert out2.shape == (B2, F)
    assert jnp.allclose(out2, ref2, rtol=1e-4, atol=1e-4), "mismatch vs reference (multi-tile)"

    print("KERNEL_OK")
</pallas_src>

<mosaic_0001>
module attributes {stable_mosaic.version = 11 : i64} {
  func.func @simple_recurrent_kernel(%arg0: i32, %arg1: memref<5x8xf32, #tpu.memory_space<vmem>>, %arg2: memref<2x5x6xf32, #tpu.memory_space<vmem>>, %arg3: memref<5x8xf32, #tpu.memory_space<vmem>>) attributes {dimension_semantics = [#tpu.dimension_semantics<parallel>], iteration_bounds = array<i64: 1>, scalar_prefetch = 0 : i64, scratch_operands = 0 : i64, tpu.core_type = #tpu.core_type<tc>, window_params = [{transform_indices = @transform_0, window_bounds = array<i64: 5, 8>}, {pipeline_mode = #tpu.pipeline_mode<synchronous>, transform_indices = @transform_1, window_bounds = array<i64: 2, 5, 6>}, {transform_indices = @transform_2, window_bounds = array<i64: 5, 8>}]} {
    %c0 = arith.constant 0 : index
    %c0_0 = arith.constant 0 : index
    %0 = vector.load %arg1[%c0, %c0_0] : memref<5x8xf32, #tpu.memory_space<vmem>>, vector<5x8xf32>
    %c0_1 = arith.constant 0 : index
    %c0_2 = arith.constant 0 : index
    %c0_3 = arith.constant 0 : index
    %1 = vector.load %arg2[%c0_1, %c0_2, %c0_3] : memref<2x5x6xf32, #tpu.memory_space<vmem>>, vector<1x5x6xf32>
    %2 = vector.shape_cast %1 : vector<1x5x6xf32> to vector<5x6xf32>
    %c1 = arith.constant 1 : index
    %c0_4 = arith.constant 0 : index
    %c0_5 = arith.constant 0 : index
    %3 = vector.load %arg2[%c1, %c0_4, %c0_5] : memref<2x5x6xf32, #tpu.memory_space<vmem>>, vector<1x5x6xf32>
    %4 = vector.shape_cast %3 : vector<1x5x6xf32> to vector<5x6xf32>
    %5 = vector.extract_strided_slice %2 {offsets = [0, 0], sizes = [5, 5], strides = [1, 1]} : vector<5x6xf32> to vector<5x5xf32>
    %6 = vector.extract_strided_slice %2 {offsets = [0, 5], sizes = [5, 1], strides = [1, 1]} : vector<5x6xf32> to vector<5x1xf32>
    %7 = vector.extract_strided_slice %4 {offsets = [0, 0], sizes = [5, 5], strides = [1, 1]} : vector<5x6xf32> to vector<5x5xf32>
    %8 = vector.extract_strided_slice %4 {offsets = [0, 5], sizes = [5, 1], strides = [1, 1]} : vector<5x6xf32> to vector<5x1xf32>
    %9 = vector.extract_strided_slice %5 {offsets = [0, 0], sizes = [5, 1], strides = [1, 1]} : vector<5x5xf32> to vector<5x1xf32>
    %10 = vector.extract_strided_slice %0 {offsets = [0, 0], sizes = [1, 8], strides = [1, 1]} : vector<5x8xf32> to vector<1x8xf32>
    %11 = vector.broadcast %9 : vector<5x1xf32> to vector<5x8xf32>
    %12 = vector.broadcast %10 : vector<1x8xf32> to vector<5x8xf32>
    %13 = arith.mulf %11, %12 : vector<5x8xf32>
    %14 = vector.extract_strided_slice %5 {offsets = [0, 1], sizes = [5, 1], strides = [1, 1]} : vector<5x5xf32> to vector<5x1xf32>
    %15 = vector.extract_strided_slice %0 {offsets = [1, 0], sizes = [1, 8], strides = [1, 1]} : vector<5x8xf32> to vector<1x8xf32>
    %16 = vector.broadcast %14 : vector<5x1xf32> to vector<5x8xf32>
    %17 = vector.broadcast %15 : vector<1x8xf32> to vector<5x8xf32>
    %18 = arith.mulf %16, %17 : vector<5x8xf32>
    %19 = arith.addf %13, %18 : vector<5x8xf32>
    %20 = vector.extract_strided_slice %5 {offsets = [0, 2], sizes = [5, 1], strides = [1, 1]} : vector<5x5xf32> to vector<5x1xf32>
    %21 = vector.extract_strided_slice %0 {offsets = [2, 0], sizes = [1, 8], strides = [1, 1]} : vector<5x8xf32> to vector<1x8xf32>
    %22 = vector.broadcast %20 : vector<5x1xf32> to vector<5x8xf32>
    %23 = vector.broadcast %21 : vector<1x8xf32> to vector<5x8xf32>
    %24 = arith.mulf %22, %23 : vector<5x8xf32>
    %25 = vector.extract_strided_slice %5 {offsets = [0, 3], sizes = [5, 1], strides = [1, 1]} : vector<5x5xf32> to vector<5x1xf32>
    %26 = vector.extract_strided_slice %0 {offsets = [3, 0], sizes = [1, 8], strides = [1, 1]} : vector<5x8xf32> to vector<1x8xf32>
    %27 = vector.broadcast %25 : vector<5x1xf32> to vector<5x8xf32>
    %28 = vector.broadcast %26 : vector<1x8xf32> to vector<5x8xf32>
    %29 = arith.mulf %27, %28 : vector<5x8xf32>
    %30 = arith.addf %24, %29 : vector<5x8xf32>
    %31 = vector.extract_strided_slice %5 {offsets = [0, 4], sizes = [5, 1], strides = [1, 1]} : vector<5x5xf32> to vector<5x1xf32>
    %32 = vector.extract_strided_slice %0 {offsets = [4, 0], sizes = [1, 8], strides = [1, 1]} : vector<5x8xf32> to vector<1x8xf32>
    %33 = vector.broadcast %31 : vector<5x1xf32> to vector<5x8xf32>
    %34 = vector.broadcast %32 : vector<1x8xf32> to vector<5x8xf32>
    %35 = arith.mulf %33, %34 : vector<5x8xf32>
    %36 = vector.broadcast %6 : vector<5x1xf32> to vector<5x8xf32>
    %37 = arith.addf %35, %36 : vector<5x8xf32>
    %38 = arith.addf %19, %30 : vector<5x8xf32>
    %39 = arith.addf %38, %37 : vector<5x8xf32>
    %40 = vector.extract_strided_slice %7 {offsets = [0, 0], sizes = [5, 1], strides = [1, 1]} : vector<5x5xf32> to vector<5x1xf32>
    %41 = vector.extract_strided_slice %39 {offsets = [0, 0], sizes = [1, 8], strides = [1, 1]} : vector<5x8xf32> to vector<1x8xf32>
    %42 = vector.broadcast %40 : vector<5x1xf32> to vector<5x8xf32>
    %43 = vector.broadcast %41 : vector<1x8xf32> to vector<5x8xf32>
    %44 = arith.mulf %42, %43 : vector<5x8xf32>
    %45 = vector.extract_strided_slice %7 {offsets = [0, 1], sizes = [5, 1], strides = [1, 1]} : vector<5x5xf32> to vector<5x1xf32>
    %46 = vector.extract_strided_slice %39 {offsets = [1, 0], sizes = [1, 8], strides = [1, 1]} : vector<5x8xf32> to vector<1x8xf32>
    %47 = vector.broadcast %45 : vector<5x1xf32> to vector<5x8xf32>
    %48 = vector.broadcast %46 : vector<1x8xf32> to vector<5x8xf32>
    %49 = arith.mulf %47, %48 : vector<5x8xf32>
    %50 = arith.addf %44, %49 : vector<5x8xf32>
    %51 = vector.extract_strided_slice %7 {offsets = [0, 2], sizes = [5, 1], strides = [1, 1]} : vector<5x5xf32> to vector<5x1xf32>
    %52 = vector.extract_strided_slice %39 {offsets = [2, 0], sizes = [1, 8], strides = [1, 1]} : vector<5x8xf32> to vector<1x8xf32>
    %53 = vector.broadcast %51 : vector<5x1xf32> to vector<5x8xf32>
    %54 = vector.broadcast %52 : vector<1x8xf32> to vector<5x8xf32>
    %55 = arith.mulf %53, %54 : vector<5x8xf32>
    %56 = vector.extract_strided_slice %7 {offsets = [0, 3], sizes = [5, 1], strides = [1, 1]} : vector<5x5xf32> to vector<5x1xf32>
    %57 = vector.extract_strided_slice %39 {offsets = [3, 0], sizes = [1, 8], strides = [1, 1]} : vector<5x8xf32> to vector<1x8xf32>
    %58 = vector.broadcast %56 : vector<5x1xf32> to vector<5x8xf32>
    %59 = vector.broadcast %57 : vector<1x8xf32> to vector<5x8xf32>
    %60 = arith.mulf %58, %59 : vector<5x8xf32>
    %61 = arith.addf %55, %60 : vector<5x8xf32>
    %62 = vector.extract_strided_slice %7 {offsets = [0, 4], sizes = [5, 1], strides = [1, 1]} : vector<5x5xf32> to vector<5x1xf32>
    %63 = vector.extract_strided_slice %39 {offsets = [4, 0], sizes = [1, 8], strides = [1, 1]} : vector<5x8xf32> to vector<1x8xf32>
    %64 = vector.broadcast %62 : vector<5x1xf32> to vector<5x8xf32>
    %65 = vector.broadcast %63 : vector<1x8xf32> to vector<5x8xf32>
    %66 = arith.mulf %64, %65 : vector<5x8xf32>
    %67 = vector.broadcast %8 : vector<5x1xf32> to vector<5x8xf32>
    %68 = arith.addf %66, %67 : vector<5x8xf32>
    %69 = arith.addf %50, %61 : vector<5x8xf32>
    %70 = arith.addf %69, %68 : vector<5x8xf32>
    %71 = arith.mulf %70, %70 : vector<5x8xf32>
    %72 = arith.mulf %71, %70 : vector<5x8xf32>
    %73 = vector.extract_strided_slice %7 {offsets = [0, 0], sizes = [5, 1], strides = [1, 1]} : vector<5x5xf32> to vector<5x1xf32>
    %74 = vector.extract_strided_slice %72 {offsets = [0, 0], sizes = [1, 8], strides = [1, 1]} : vector<5x8xf32> to vector<1x8xf32>
    %75 = vector.broadcast %73 : vector<5x1xf32> to vector<5x8xf32>
    %76 = vector.broadcast %74 : vector<1x8xf32> to vector<5x8xf32>
    %77 = arith.mulf %75, %76 : vector<5x8xf32>
    %78 = vector.extract_strided_slice %7 {offsets = [0, 1], sizes = [5, 1], strides = [1, 1]} : vector<5x5xf32> to vector<5x1xf32>
    %79 = vector.extract_strided_slice %72 {offsets = [1, 0], sizes = [1, 8], strides = [1, 1]} : vector<5x8xf32> to vector<1x8xf32>
    %80 = vector.broadcast %78 : vector<5x1xf32> to vector<5x8xf32>
    %81 = vector.broadcast %79 : vector<1x8xf32> to vector<5x8xf32>
    %82 = arith.mulf %80, %81 : vector<5x8xf32>
    %83 = arith.addf %77, %82 : vector<5x8xf32>
    %84 = vector.extract_strided_slice %7 {offsets = [0, 2], sizes = [5, 1], strides = [1, 1]} : vector<5x5xf32> to vector<5x1xf32>
    %85 = vector.extract_strided_slice %72 {offsets = [2, 0], sizes = [1, 8], strides = [1, 1]} : vector<5x8xf32> to vector<1x8xf32>
    %86 = vector.broadcast %84 : vector<5x1xf32> to vector<5x8xf32>
    %87 = vector.broadcast %85 : vector<1x8xf32> to vector<5x8xf32>
    %88 = arith.mulf %86, %87 : vector<5x8xf32>
    %89 = vector.extract_strided_slice %7 {offsets = [0, 3], sizes = [5, 1], strides = [1, 1]} : vector<5x5xf32> to vector<5x1xf32>
    %90 = vector.extract_strided_slice %72 {offsets = [3, 0], sizes = [1, 8], strides = [1, 1]} : vector<5x8xf32> to vector<1x8xf32>
    %91 = vector.broadcast %89 : vector<5x1xf32> to vector<5x8xf32>
    %92 = vector.broadcast %90 : vector<1x8xf32> to vector<5x8xf32>
    %93 = arith.mulf %91, %92 : vector<5x8xf32>
    %94 = arith.addf %88, %93 : vector<5x8xf32>
    %95 = vector.extract_strided_slice %7 {offsets = [0, 4], sizes = [5, 1], strides = [1, 1]} : vector<5x5xf32> to vector<5x1xf32>
    %96 = vector.extract_strided_slice %72 {offsets = [4, 0], sizes = [1, 8], strides = [1, 1]} : vector<5x8xf32> to vector<1x8xf32>
    %97 = vector.broadcast %95 : vector<5x1xf32> to vector<5x8xf32>
    %98 = vector.broadcast %96 : vector<1x8xf32> to vector<5x8xf32>
    %99 = arith.mulf %97, %98 : vector<5x8xf32>
    %100 = vector.broadcast %8 : vector<5x1xf32> to vector<5x8xf32>
    %101 = arith.addf %99, %100 : vector<5x8xf32>
    %102 = arith.addf %83, %94 : vector<5x8xf32>
    %103 = arith.addf %102, %101 : vector<5x8xf32>
    %c0_6 = arith.constant 0 : index
    %c0_7 = arith.constant 0 : index
    %104 = vector.load %arg3[%c0_6, %c0_7] : memref<5x8xf32, #tpu.memory_space<vmem>>, vector<5x8xf32>
    tpu.vector_store %arg3[%c0_6, %c0_7], %103 {strides = array<i32>} : memref<5x8xf32, #tpu.memory_space<vmem>>, vector<5x8xf32>,
    return
  }
  func.func @transform_0(%arg0: i32) -> (i32, i32) {
    %c0_i32 = arith.constant 0 : i32
    %c0_i32_0 = arith.constant 0 : i32
    return %c0_i32, %arg0 : i32, i32
  }
  func.func @transform_1(%arg0: i32) -> (i32, i32, i32) {
    %c0_i32 = arith.constant 0 : i32
    %c0_i32_0 = arith.constant 0 : i32
    %c0_i32_1 = arith.constant 0 : i32
    %c0_i32_2 = arith.constant 0 : i32
    return %c0_i32, %c0_i32_0, %c0_i32_1 : i32, i32, i32
  }
  func.func @transform_2(%arg0: i32) -> (i32, i32) {
    %c0_i32 = arith.constant 0 : i32
    %c0_i32_0 = arith.constant 0 : i32
    return %c0_i32, %arg0 : i32, i32
  }
}

</mosaic_0001>

<bundles_post_ra>
// kernel: simple_recurrent_t.1
= control target key start
LH: loop header
LB: loop body
LE: loop exit
PB: predicated region body
PF: predicated region fallthrough
CT: control target
= control target key end

     0   :  { %v178_v1 = vmov 2   ;;  %v179_v2 = vmov 0   ;;  %s212_s0 = inlined_call_operand.vmem [shape: f32[5,8], index: 0, kind: input, shape index: {}]   ;;  %s213_s1 = inlined_call_operand.vmem [shape: f32[2,5,6], index: 1, kind: input, shape index: {}]   ;;  %s214_s2 = inlined_call_operand.hbm [shape: f32[5,8], index: 2, kind: output, shape index: {}]  }
   0x1   :  { %v13_v0 = vld [vmem:[%s213_s1] sm:$0x1f]  ;;  %141 = vset.pattern.permute.xlu1 %v178_v1  ;;  %139 = vset.pattern.permute.xlu0 %v179_v2 }
   0x2   :  { %7 = vsyncpa [#allocation3], 0  ;;  %31 = vperm.xlu1 %141, %v13_v0   ;;  %18 = vperm.xlu0 %139, %v13_v0   ;;  %v180_v3 = vmov 4   ;;  %v181_v4 = vmov 3   ;;  %v182_v5 = vmov 1   ;;  %v183_v6 = vmov 5  }
   0x3   :  { %143 = vset.pattern.permute.xlu2 %v180_v3  ;;  %v131_v7 = vld [vmem:[%s213_s1 + $0x8] sm:$0x1f]  ;;  %v12_v11 = vld [vmem:[%s212_s0] sm:$0x1f]  ;;  %s184_s0 = smov [#allocation2]   ;;  %s122_s17 = sshll.u32 %s214_s2, 4  ;;  %s123_s17 = int_to_ptr.hbm [resolvable:$true] %s122_s17 }
   0x4   :  { %44 = vperm.xlu2 %143, %v13_v0   ;;  %v21_v12 = vperm.slane %v12_v11, 0  ;;  %v40_v13 = vperm.slane %v12_v11, 3  ;;  %v27_v14 = vperm.slane %v12_v11, 1  ;;  %v34_v15 = vperm.slane %v12_v11, 2  ;;  %s120_s1 = sshll.u32 %s184_s0, 4  ;;  %s121_s1 = int_to_ptr.vmem [resolvable:$true] %s120_s1 }
   0x5   :  { %v47_v22 = vperm.slane %v12_v11, 4  ;;  %vm113_vm0 = vcmask 61440  }
   0xa   :  { %142 = vset.pattern.permute.xlu1 %v181_v4  ;;  %140 = vset.pattern.permute.xlu0 %v182_v5 }
   0xb   :  { %37 = vperm.xlu1 %142, %v13_v0   ;;  %24 = vperm.xlu0 %140, %v13_v0  }
   0xc   :  { %144 = vset.pattern.permute.xlu2 %v183_v6 }
   0xd   :  { %50 = vperm.xlu2 %144, %v13_v0  }
  0x13   :  { %145 = vset.pattern.permute.xlu1 %v179_v2  ;;  %147 = vset.pattern.permute.xlu0 %v178_v1 }
  0x14   :  { %58 = vperm.xlu1 %145, %v131_v7   ;;  %71 = vperm.xlu0 %147, %v131_v7  }
  0x15   :  { %146 = vset.pattern.permute.xlu2 %v182_v5 }
  0x16   :  { %64 = vperm.xlu2 %146, %v131_v7  }
  0x1c   :  { %148 = vset.pattern.permute.xlu1 %v181_v4  ;;  %151 = vset.pattern.permute.xlu0 %v183_v6 }
  0x1d   :  { %77 = vperm.xlu1 %148, %v131_v7  }
  0x1e   :  { %149 = vset.pattern.permute.xlu2 %v180_v3 }
  0x1f   :  { %84 = vperm.xlu2 %149, %v131_v7  }
  0x25   :  { %150 = vset.pattern.permute.xlu1 %v183_v6 }
  0x26   :  { %90 = vperm.xlu1 %150, %v131_v7  }
  0x5e   :  { %v45_v10 = vpop.permute.xlu2 %44 }
  0x5f   :  { %v48_v26 = vmul.f32 %v47_v22, %v45_v10 }
  0x67   :  { %v51_v21 = vpop.permute.xlu2 %50 }
  0x68   :  { %v53_v29 = vadd.f32 %v51_v21, %v48_v26 }
  0x70   :  { %v65_v30 = vpop.permute.xlu2 %64 }
  0x74   :  { %v32_v8 = vpop.permute.xlu1 %31  ;;  %v19_v9 = vpop.permute.xlu0 %18 }
  0x75   :  { %v22_v18 = vmul.f32 %v21_v12, %v19_v9  ;;  %v35_v23 = vmul.f32 %v34_v15, %v32_v8 }
  0x79   :  { %v85_v43 = vpop.permute.xlu2 %84 }
  0x7d   :  { %v38_v16 = vpop.permute.xlu1 %37  ;;  %v25_v17 = vpop.permute.xlu0 %24 }
  0x7e   :  { %v41_v19 = vmul.f32 %v40_v13, %v38_v16  ;;  %v28_v20 = vmul.f32 %v27_v14, %v25_v17 }
  0x80   :  { %v42_v24 = vadd.f32 %v41_v19, %v35_v23  ;;  %v29_v25 = vadd.f32 %v28_v20, %v22_v18 }
  0x82   :  { %v54_v28 = vadd.f32 %v42_v24, %v29_v25 }
  0x84   :  { %v55_v31 = vadd.f32 %v54_v28, %v53_v29 }
  0x86   :  { %v59_v27 = vpop.permute.xlu1 %58  ;;  %v67_v32 = vperm.slane %v55_v31, 1  ;;  %v61_v33 = vperm.slane %v55_v31, 0  ;;  %v74_v34 = vperm.slane %v55_v31, 2  ;;  %v80_v36 = vperm.slane %v55_v31, 3  ;;  %v72_v37 = vpop.permute.xlu0 %71 }
  0x87   :  { %v87_v41 = vperm.slane %v55_v31, 4 }
  0x88   :  { %v68_v39 = vmul.f32 %v67_v32, %v65_v30  ;;  %v62_v40 = vmul.f32 %v61_v33, %v59_v27  ;;  %v75_v42 = vmul.f32 %v74_v34, %v72_v37 }
  0x89   :  { %v88_v46 = vmul.f32 %v87_v41, %v85_v43 }
  0x8a   :  { %v69_v45 = vadd.f32 %v68_v39, %v62_v40 }
  0x8f   :  { %v78_v35 = vpop.permute.xlu1 %77 }
  0x90   :  { %v81_v38 = vmul.f32 %v80_v36, %v78_v35 }
  0x92   :  { %v82_v44 = vadd.f32 %v81_v38, %v75_v42 }
  0x94   :  { %v94_v49 = vadd.f32 %v82_v44, %v69_v45 }
  0x98   :  { %v91_v47 = vpop.permute.xlu1 %90 }
  0x99   :  { %v93_v48 = vadd.f32 %v91_v47, %v88_v46 }
  0x9b   :  { %v95_v50 = vadd.f32 %v94_v49, %v93_v48 }
  0x9d   :  { %v96_v51 = vmul.f32 %v95_v50, %v95_v50 }
  0x9f   :  { %v97_v52 = vmul.f32 %v96_v51, %v95_v50 }
  0xa1   :  { %v98_v53 = vperm.slane %v97_v52, 0  ;;  %v100_v54 = vperm.slane %v97_v52, 1  ;;  %v103_v55 = vperm.slane %v97_v52, 2  ;;  %v105_v56 = vperm.slane %v97_v52, 3 }
  0xa2   :  { %v108_v57 = vperm.slane %v97_v52, 4 }
  0xa3   :  { %v99_v58 = vmul.f32 %v98_v53, %v59_v27  ;;  %v101_v59 = vmul.f32 %v100_v54, %v65_v30  ;;  %v104_v60 = vmul.f32 %v103_v55, %v72_v37  ;;  %v106_v61 = vmul.f32 %v105_v56, %v78_v35 }
  0xa4   :  { %v109_v62 = vmul.f32 %v108_v57, %v85_v43 }
  0xa5   :  { %v102_v63 = vadd.f32 %v101_v59, %v99_v58  ;;  %v107_v0 = vadd.f32 %v106_v61, %v104_v60 }
  0xa6   :  { %v110_v1 = vadd.f32 %v109_v62, %v91_v47 }
  0xa7   :  { %v111_v2 = vadd.f32 %v107_v0, %v102_v63 }
  0xa9   :  { %v112_v3 = vadd.f32 %v111_v2, %v110_v1 }
  0xab   :  { %114 = vst.msk [vmem:[#allocation2] sm:$0x1f] %vm113_vm0, %v112_v3 }
  0xac   :  { %125 = dma.vmem_to_hbm [thread:$0]  %s121_s1, 128, %s123_s17, [#allocation3]  }
  0xad   :  { %176 = dma.done.wait [#allocation3], 128  }
  0xae   :  { %177 = vsyncadd [#allocation3], 4294967168 }
  0xaf   :  { %130 = vsyncpa [#allocation3], 1 }

</bundles_post_ra>
